<compile_context>
chip_gen: v5e
topology: v5e:2x2
jax: 0.10.0
libtpu: 0.0.40
codegen_flags: <defaults>
</compile_context>

<pallas_src>
import functools

import jax
import jax.numpy as jnp
from jax.experimental import pallas as pl
from jax.experimental.pallas import tpu as pltpu

# Small, lane/sublane-consistent synthetic shapes (stand-ins for D=768, L=197).
FEAT_DIM = 64          # stands in for 768 (vit_base) / 512 (ViT-B-16)
SEQ_LEN = 16           # number of backbone cash tokens
L_TILE = 8             # streamed token-tile (multiple of 8 sublanes)
BATCH = 2              # per-modality batch
IMG_C, IMG_H, IMG_W = 3, 16, 16
LN_EPS = 1e-5          # nn.LayerNorm default


# ---------------------------------------------------------------------------
# Pallas kernel
# ---------------------------------------------------------------------------
def _mfrnet_head_kernel(cash_ref, glob_ref, ln_g_ref, ln_b_ref, w_ref, b_ref,
                        out_ref, acc_ref, *, seq_len):
    """Fused GLOBAL_LOCAL head, all 3 modalities per invocation.

    Grid: (B tiles ["parallel"], L tiles ["arbitrary" reduction]).

    cash_ref : (3, Bt, Lt, D) bf16  backbone token features (RGB/NI/TI cash)
    glob_ref : (3, Bt, D)     bf16  backbone global features
    ln_g_ref : (3, 2D)        f32   LayerNorm gamma (over the [global|local] concat)
    ln_b_ref : (3, 2D)        f32   LayerNorm beta
    w_ref    : (3, 2D, D)     bf16  Linear weight, input-major (= torch W.T)
    b_ref    : (3, 1, D)      f32   Linear bias
    out_ref  : (Bt, 3D)       f32   ori = cat([RGB_g, NI_g, TI_g], -1)
    acc_ref  : (3, Bt, D)     f32   VMEM scratch: running token sum
    """
    l = pl.program_id(1)

    @pl.when(l == 0)
    def _init():
        acc_ref[...] = jnp.zeros_like(acc_ref)

    # nn.AdaptiveAvgPool1d(1) over the token axis, streamed: accumulate the
    # per-tile token sum in f32.
    acc_ref[...] += jnp.sum(cash_ref[...].astype(jnp.float32), axis=2)

    @pl.when(l == pl.num_programs(1) - 1)
    def _finalize():
        d = glob_ref.shape[-1]
        g = glob_ref[...].astype(jnp.float32)                     # (3, Bt, D)
        # Divide by the TRUE token count (not the padded/tiled length).
        local = acc_ref[...] * (1.0 / float(seq_len))             # (3, Bt, D)

        # LayerNorm(2D) over concat([global, local], -1)  (matches torch).
        x = jnp.concatenate([g, local], axis=-1)                  # (3, Bt, 2D)
        mu = jnp.mean(x, axis=-1, keepdims=True)
        var = jnp.mean(jnp.square(x - mu), axis=-1, keepdims=True)
        xn = (x - mu) * jax.lax.rsqrt(var + LN_EPS)
        xn = xn * ln_g_ref[...][:, None, :] + ln_b_ref[...][:, None, :]

        # Single fused Linear(2D -> D), batched over the modality axis; bf16
        # operands on the MXU, f32 accumulation.
        y = jnp.einsum("mbk,mkd->mbd", xn.astype(jnp.bfloat16), w_ref[...],
                       preferred_element_type=jnp.float32) + b_ref[...]
        # QuickGELU: y * sigmoid(1.702 * y)
        y = y * jax.nn.sigmoid(1.702 * y)

        # ori = cat([RGB_global, NI_global, TI_global], -1): direct slice
        # stores (128-lane-aligned offsets at real D=768).
        out_ref[:, 0 * d:1 * d] = y[0].astype(out_ref.dtype)
        out_ref[:, 1 * d:2 * d] = y[1].astype(out_ref.dtype)
        out_ref[:, 2 * d:3 * d] = y[2].astype(out_ref.dtype)


def mfrnet_head(cash, glob, ln_gamma, ln_beta, lin_w, lin_b,
                *, b_tile=None, l_tile=None):
    """cash: (3, B, L, D) bf16, glob: (3, B, D) bf16 -> ori (B, 3*D) f32."""
    M, B, L, D = cash.shape
    assert M == 3 and glob.shape == (M, B, D)
    assert lin_w.shape == (M, 2 * D, D)
    b_tile = B if b_tile is None else b_tile
    l_tile = L if l_tile is None else l_tile
    assert B % b_tile == 0
    # TODO(synk): for real ViT L=197 (not a multiple of l_tile) the tail tile
    # must be masked before accumulation; keep the division by the true L.
    assert L % l_tile == 0
    grid = (B // b_tile, L // l_tile)

    kernel = functools.partial(_mfrnet_head_kernel, seq_len=L)
    return pl.pallas_call(
        kernel,
        out_shape=jax.ShapeDtypeStruct((B, 3 * D), jnp.float32),
        grid_spec=pltpu.PrefetchScalarGridSpec(
            num_scalar_prefetch=0,
            grid=grid,
            in_specs=[
                # HBM-heavy stream: double-buffered (3, Bt, Lt, D) bf16 tiles.
                pl.BlockSpec((M, b_tile, l_tile, D), lambda b, l: (0, b, l, 0)),
                pl.BlockSpec((M, b_tile, D), lambda b, l: (0, b, 0)),
                pl.BlockSpec((M, 2 * D), lambda b, l: (0, 0)),
                pl.BlockSpec((M, 2 * D), lambda b, l: (0, 0)),
                pl.BlockSpec((M, 2 * D, D), lambda b, l: (0, 0, 0)),
                pl.BlockSpec((M, 1, D), lambda b, l: (0, 0, 0)),
            ],
            out_specs=pl.BlockSpec((b_tile, 3 * D), lambda b, l: (b, 0)),
            scratch_shapes=[pltpu.VMEM((M, b_tile, D), jnp.float32)],
        ),
        compiler_params=pltpu.CompilerParams(
            dimension_semantics=("parallel", "arbitrary"),
            vmem_limit_bytes=48 * 1024 * 1024,
        ),
    )(cash, glob, ln_gamma, ln_beta, lin_w, lin_b)


# ---------------------------------------------------------------------------
# Pure-JAX reference of the head (for a tolerance check).
# ---------------------------------------------------------------------------
def mfrnet_head_ref(cash, glob, ln_gamma, ln_beta, lin_w, lin_b):
    cash = cash.astype(jnp.float32)
    g = glob.astype(jnp.float32)
    local = jnp.mean(cash, axis=2)
    x = jnp.concatenate([g, local], axis=-1)
    mu = jnp.mean(x, axis=-1, keepdims=True)
    var = jnp.mean((x - mu) ** 2, axis=-1, keepdims=True)
    xn = (x - mu) / jnp.sqrt(var + LN_EPS)
    xn = xn * ln_gamma[:, None, :] + ln_beta[:, None, :]
    y = jnp.einsum("mbk,mkd->mbd",
                   xn.astype(jnp.bfloat16).astype(jnp.float32),
                   lin_w.astype(jnp.float32)) + lin_b
    y = y * jax.nn.sigmoid(1.702 * y)
    return jnp.concatenate([y[0], y[1], y[2]], axis=-1)


# ---------------------------------------------------------------------------
# Deterministic parameter / stub-backbone setup (plain JAX glue).
# ---------------------------------------------------------------------------
def make_params(key):
    D = FEAT_DIM
    ks = jax.random.split(key, 4)
    # rgb/nir/tir reduce blocks: LayerNorm(2D) + Linear(2D, D) + QuickGELU.
    ln_gamma = jnp.ones((3, 2 * D), jnp.float32)
    ln_beta = jnp.zeros((3, 2 * D), jnp.float32)
    lin_w = (jax.random.normal(ks[0], (3, 2 * D, D), jnp.float32)
             * (1.0 / jnp.sqrt(2.0 * D))).astype(jnp.bfloat16)   # bf16 weights
    lin_b = jnp.zeros((3, 1, D), jnp.float32)
    # Stub backbone projections.
    in_dim = IMG_C * IMG_H * IMG_W
    w_tok = (jax.random.normal(ks[1], (in_dim, SEQ_LEN * D), jnp.float32)
             * (1.0 / jnp.sqrt(in_dim)))
    w_glob = (jax.random.normal(ks[2], (in_dim, D), jnp.float32)
              * (1.0 / jnp.sqrt(in_dim)))
    return dict(ln_gamma=ln_gamma, ln_beta=ln_beta, lin_w=lin_w, lin_b=lin_b,
                w_tok=w_tok, w_glob=w_glob)


def stub_backbone(img_in, w_tok, w_glob):
    # TODO(synk): real BACKBONE is build_transformer(...); stubbed here.
    b3 = img_in.shape[0]
    flat = img_in.reshape(b3, -1)
    # Emit bf16 at the source: the convert fuses into the projection epilogue,
    # so there is NO standalone f32->bf16 pass over the HBM-heavy cash stream.
    cash = (flat @ w_tok).reshape(b3, SEQ_LEN, FEAT_DIM).astype(jnp.bfloat16)
    glob = (flat @ w_glob).astype(jnp.bfloat16)
    loss = jnp.float32(0.0)
    return cash, glob, loss


def mfrnet_forward_eval(x, params, miss_type="None", head_fn=mfrnet_head):
    """Inference-mode MFRNet.forward with GLOBAL_LOCAL=True, direct cat output."""
    RGB, NI, TI = x["RGB"], x["NI"], x["TI"]
    if miss_type == "r":
        RGB = jnp.zeros_like(RGB)
    elif miss_type == "n":
        NI = jnp.zeros_like(NI)
    elif miss_type == "t":
        TI = jnp.zeros_like(TI)
    elif miss_type == "rn":
        RGB, NI = jnp.zeros_like(RGB), jnp.zeros_like(NI)
    elif miss_type == "rt":
        RGB, TI = jnp.zeros_like(RGB), jnp.zeros_like(TI)
    elif miss_type == "nt":
        NI, TI = jnp.zeros_like(NI), jnp.zeros_like(TI)

    img_in = jnp.concatenate([RGB, NI, TI], axis=0)          # (3B, C, H, W)
    B = img_in.shape[0] // 3
    cash, glob, _ = stub_backbone(img_in, params["w_tok"], params["w_glob"])

    # Split per modality and stack as (modality, batch, ...).
    cash_m = jnp.stack([cash[0:B], cash[B:2 * B], cash[2 * B:3 * B]], axis=0)
    glob_m = jnp.stack([glob[0:B], glob[B:2 * B], glob[2 * B:3 * B]], axis=0)

    # Head emits ori = cat([RGB_global, NI_global, TI_global], -1) directly.
    ori = head_fn(cash_m, glob_m, params["ln_gamma"], params["ln_beta"],
                  params["lin_w"], params["lin_b"])
    return ori                                                # (B, 3*FEAT_DIM)


if __name__ == "__main__":
    key = jax.random.PRNGKey(0)
    k_rgb, k_ni, k_ti, k_par = jax.random.split(key, 4)
    x = {
        "RGB": jax.random.normal(k_rgb, (BATCH, IMG_C, IMG_H, IMG_W), jnp.float32),
        "NI": jax.random.normal(k_ni, (BATCH, IMG_C, IMG_H, IMG_W), jnp.float32),
        "TI": jax.random.normal(k_ti, (BATCH, IMG_C, IMG_H, IMG_W), jnp.float32),
        "cam_label": jnp.int32(0),
    }
    params = make_params(k_par)

    head_kernel = functools.partial(mfrnet_head, l_tile=L_TILE)
    ori = mfrnet_forward_eval(x, params, head_fn=head_kernel)
    ori = jax.block_until_ready(ori)

    # Pure-JAX reference check (bf16 inputs/weights, f32 math).
    ori_ref = mfrnet_forward_eval(x, params, head_fn=mfrnet_head_ref)
    ori_ref = jax.block_until_ready(ori_ref)

    assert ori.shape == (BATCH, 3 * FEAT_DIM), ori.shape
    assert bool(jnp.all(jnp.isfinite(ori)))
    assert bool(jnp.allclose(ori, ori_ref, rtol=5e-2, atol=5e-2)), (
        float(jnp.max(jnp.abs(ori - ori_ref))))
    print("KERNEL_OK")
</pallas_src>

<mosaic_0001>
module attributes {stable_mosaic.version = 11 : i64} {
  func.func @_mfrnet_head_kernel(%arg0: i32, %arg1: i32, %arg2: memref<3x2x8x64xbf16, #tpu.memory_space<vmem>>, %arg3: memref<3x2x64xbf16, #tpu.memory_space<vmem>>, %arg4: memref<3x128xf32, #tpu.memory_space<vmem>>, %arg5: memref<3x128xf32, #tpu.memory_space<vmem>>, %arg6: memref<3x128x64xbf16, #tpu.memory_space<vmem>>, %arg7: memref<3x1x64xf32, #tpu.memory_space<vmem>>, %arg8: memref<2x192xf32, #tpu.memory_space<vmem>>, %arg9: memref<3x2x64xf32, #tpu.memory_space<vmem>>) attributes {dimension_semantics = [#tpu.dimension_semantics<parallel>, #tpu.dimension_semantics<arbitrary>], iteration_bounds = array<i64: 1, 2>, scalar_prefetch = 0 : i64, scratch_operands = 1 : i64, tpu.core_type = #tpu.core_type<tc>, window_params = [{transform_indices = @transform_0, window_bounds = array<i64: 3, 2, 8, 64>}, {transform_indices = @transform_1, window_bounds = array<i64: 3, 2, 64>}, {pipeline_mode = #tpu.pipeline_mode<synchronous>, transform_indices = @transform_2, window_bounds = array<i64: 3, 128>}, {pipeline_mode = #tpu.pipeline_mode<synchronous>, transform_indices = @transform_3, window_bounds = array<i64: 3, 128>}, {pipeline_mode = #tpu.pipeline_mode<synchronous>, transform_indices = @transform_4, window_bounds = array<i64: 3, 128, 64>}, {pipeline_mode = #tpu.pipeline_mode<synchronous>, transform_indices = @transform_5, window_bounds = array<i64: 3, 1, 64>}, {transform_indices = @transform_6, window_bounds = array<i64: 2, 192>}]} {
    %c0_i32 = arith.constant 0 : i32
    %0 = arith.cmpi eq, %arg1, %c0_i32 : i32
    %1 = arith.extui %0 : i1 to i32
    %c0_i32_0 = arith.constant 0 : i32
    %2 = arith.cmpi ne, %1, %c0_i32_0 : i32
    scf.if %2 {
      %cst_11 = arith.constant 0.000000e+00 : f32
      %12 = vector.broadcast %cst_11 : f32 to vector<3x2x64xf32>
      %c0_12 = arith.constant 0 : index
      %c0_13 = arith.constant 0 : index
      %c0_14 = arith.constant 0 : index
      %13 = vector.load %arg9[%c0_12, %c0_13, %c0_14] : memref<3x2x64xf32, #tpu.memory_space<vmem>>, vector<3x2x64xf32>
      tpu.vector_store %arg9[%c0_12, %c0_13, %c0_14], %12 {strides = array<i32>} : memref<3x2x64xf32, #tpu.memory_space<vmem>>, vector<3x2x64xf32>,
    } else {
    }
    %c0 = arith.constant 0 : index
    %c0_1 = arith.constant 0 : index
    %c0_2 = arith.constant 0 : index
    %3 = vector.load %arg9[%c0, %c0_1, %c0_2] : memref<3x2x64xf32, #tpu.memory_space<vmem>>, vector<3x2x64xf32>
    %c0_3 = arith.constant 0 : index
    %c0_4 = arith.constant 0 : index
    %c0_5 = arith.constant 0 : index
    %c0_6 = arith.constant 0 : index
    %4 = vector.load %arg2[%c0_3, %c0_4, %c0_5, %c0_6] : memref<3x2x8x64xbf16, #tpu.memory_space<vmem>>, vector<3x2x8x64xbf16>
    %5 = arith.extf %4 : vector<3x2x8x64xbf16> to vector<3x2x8x64xf32>
    %cst = arith.constant dense<0.000000e+00> : vector<3x2x64xf32>
    %6 = vector.multi_reduction <add>, %5, %cst [2] : vector<3x2x8x64xf32> to vector<3x2x64xf32>
    %7 = arith.addf %3, %6 : vector<3x2x64xf32>
    %c0_7 = arith.constant 0 : index
    %c0_8 = arith.constant 0 : index
    %c0_9 = arith.constant 0 : index
    %8 = vector.load %arg9[%c0_7, %c0_8, %c0_9] : memref<3x2x64xf32, #tpu.memory_space<vmem>>, vector<3x2x64xf32>
    tpu.vector_store %arg9[%c0_7, %c0_8, %c0_9], %7 {strides = array<i32>} : memref<3x2x64xf32, #tpu.memory_space<vmem>>, vector<3x2x64xf32>,
    %c1_i32 = arith.constant 1 : i32
    %9 = arith.cmpi eq, %arg1, %c1_i32 : i32
    %10 = arith.extui %9 : i1 to i32
    %c0_i32_10 = arith.constant 0 : i32
    %11 = arith.cmpi ne, %10, %c0_i32_10 : i32
    scf.if %11 {
      %c0_11 = arith.constant 0 : index
      %c0_12 = arith.constant 0 : index
      %c0_13 = arith.constant 0 : index
      %12 = vector.load %arg3[%c0_11, %c0_12, %c0_13] : memref<3x2x64xbf16, #tpu.memory_space<vmem>>, vector<3x2x64xbf16>
      %13 = arith.extf %12 : vector<3x2x64xbf16> to vector<3x2x64xf32>
      %c0_14 = arith.constant 0 : index
      %c0_15 = arith.constant 0 : index
      %c0_16 = arith.constant 0 : index
      %14 = vector.load %arg9[%c0_14, %c0_15, %c0_16] : memref<3x2x64xf32, #tpu.memory_space<vmem>>, vector<3x2x64xf32>
      %cst_17 = arith.constant 6.250000e-02 : f32
      %15 = vector.broadcast %cst_17 : f32 to vector<3x2x64xf32>
      %16 = arith.mulf %14, %15 : vector<3x2x64xf32>
      %17 = tpu.concatenate %13, %16 in 2 : vector<3x2x64xf32>, vector<3x2x64xf32> -> vector<3x2x128xf32>
      %cst_18 = arith.constant dense<0.000000e+00> : vector<3x2xf32>
      %18 = vector.multi_reduction <add>, %17, %cst_18 [2] : vector<3x2x128xf32> to vector<3x2xf32>
      %19 = vector.shape_cast %18 : vector<3x2xf32> to vector<3x2x1xf32>
      %cst_19 = arith.constant 1.280000e+02 : f32
      %20 = vector.broadcast %cst_19 : f32 to vector<3x2x1xf32>
      %21 = arith.divf %19, %20 : vector<3x2x1xf32>
      %22 = vector.broadcast %21 : vector<3x2x1xf32> to vector<3x2x128xf32>
      %23 = arith.subf %17, %22 : vector<3x2x128xf32>
      %24 = arith.mulf %23, %23 : vector<3x2x128xf32>
      %cst_20 = arith.constant dense<0.000000e+00> : vector<3x2xf32>
      %25 = vector.multi_reduction <add>, %24, %cst_20 [2] : vector<3x2x128xf32> to vector<3x2xf32>
      %26 = vector.shape_cast %25 : vector<3x2xf32> to vector<3x2x1xf32>
      %cst_21 = arith.constant 1.280000e+02 : f32
      %27 = vector.broadcast %cst_21 : f32 to vector<3x2x1xf32>
      %28 = arith.divf %26, %27 : vector<3x2x1xf32>
      %29 = vector.broadcast %21 : vector<3x2x1xf32> to vector<3x2x128xf32>
      %30 = arith.subf %17, %29 : vector<3x2x128xf32>
      %cst_22 = arith.constant 9.99999974E-6 : f32
      %31 = vector.broadcast %cst_22 : f32 to vector<3x2x1xf32>
      %32 = arith.addf %28, %31 : vector<3x2x1xf32>
      %33 = math.rsqrt %32 : vector<3x2x1xf32>
      %34 = vector.broadcast %33 : vector<3x2x1xf32> to vector<3x2x128xf32>
      %35 = arith.mulf %30, %34 : vector<3x2x128xf32>
      %c0_23 = arith.constant 0 : index
      %c0_24 = arith.constant 0 : index
      %36 = vector.load %arg4[%c0_23, %c0_24] : memref<3x128xf32, #tpu.memory_space<vmem>>, vector<3x128xf32>
      %37 = vector.shape_cast %36 : vector<3x128xf32> to vector<3x1x128xf32>
      %38 = vector.broadcast %37 : vector<3x1x128xf32> to vector<3x2x128xf32>
      %39 = arith.mulf %35, %38 : vector<3x2x128xf32>
      %c0_25 = arith.constant 0 : index
      %c0_26 = arith.constant 0 : index
      %40 = vector.load %arg5[%c0_25, %c0_26] : memref<3x128xf32, #tpu.memory_space<vmem>>, vector<3x128xf32>
      %41 = vector.shape_cast %40 : vector<3x128xf32> to vector<3x1x128xf32>
      %42 = vector.broadcast %41 : vector<3x1x128xf32> to vector<3x2x128xf32>
      %43 = arith.addf %39, %42 : vector<3x2x128xf32>
      %44 = arith.truncf %43 : vector<3x2x128xf32> to vector<3x2x128xbf16>
      %c0_27 = arith.constant 0 : index
      %c0_28 = arith.constant 0 : index
      %c0_29 = arith.constant 0 : index
      %45 = vector.load %arg6[%c0_27, %c0_28, %c0_29] : memref<3x128x64xbf16, #tpu.memory_space<vmem>>, vector<3x128x64xbf16>
      "tpu.trace_start"() <{level = 10 : i32, message = "mbk,mkd->mbd"}> : () -> ()
      %cst_30 = arith.constant dense<0.000000e+00> : vector<3x2x64xf32>
      %46 = tpu.matmul %44, %45, %cst_30 {dimension_numbers = #tpu.dot_dimension_numbers<[2], [1], [1], [2], [0, 0, 0, 1, 1, 2], [0], [0]>} : vector<3x2x128xbf16>, vector<3x128x64xbf16>, vector<3x2x64xf32> -> vector<3x2x64xf32>
      "tpu.trace_stop"() : () -> ()
      %c0_31 = arith.constant 0 : index
      %c0_32 = arith.constant 0 : index
      %c0_33 = arith.constant 0 : index
      %47 = vector.load %arg7[%c0_31, %c0_32, %c0_33] : memref<3x1x64xf32, #tpu.memory_space<vmem>>, vector<3x1x64xf32>
      %48 = vector.broadcast %47 : vector<3x1x64xf32> to vector<3x2x64xf32>
      %49 = arith.addf %46, %48 : vector<3x2x64xf32>
      %cst_34 = arith.constant 1.702000e+00 : f32
      %50 = vector.broadcast %cst_34 : f32 to vector<3x2x64xf32>
      %51 = arith.mulf %50, %49 : vector<3x2x64xf32>
      %52 = arith.negf %51 : vector<3x2x64xf32>
      %53 = math.exp %52 : vector<3x2x64xf32>
      %cst_35 = arith.constant 1.000000e+00 : f32
      %54 = vector.broadcast %cst_35 : f32 to vector<3x2x64xf32>
      %55 = arith.addf %54, %53 : vector<3x2x64xf32>
      %56 = arith.divf %54, %55 : vector<3x2x64xf32>
      %57 = arith.mulf %49, %56 : vector<3x2x64xf32>
      %58 = vector.extract_strided_slice %57 {offsets = [0, 0, 0], sizes = [1, 2, 64], strides = [1, 1, 1]} : vector<3x2x64xf32> to vector<1x2x64xf32>
      %59 = vector.shape_cast %58 : vector<1x2x64xf32> to vector<2x64xf32>
      %c0_36 = arith.constant 0 : index
      %c0_37 = arith.constant 0 : index
      %60 = vector.load %arg8[%c0_36, %c0_37] : memref<2x192xf32, #tpu.memory_space<vmem>>, vector<2x64xf32>
      tpu.vector_store %arg8[%c0_36, %c0_37], %59 {strides = array<i32>} : memref<2x192xf32, #tpu.memory_space<vmem>>, vector<2x64xf32>,
      %61 = vector.extract_strided_slice %57 {offsets = [1, 0, 0], sizes = [1, 2, 64], strides = [1, 1, 1]} : vector<3x2x64xf32> to vector<1x2x64xf32>
      %62 = vector.shape_cast %61 : vector<1x2x64xf32> to vector<2x64xf32>
      %c0_38 = arith.constant 0 : index
      %c64 = arith.constant 64 : index
      %63 = vector.load %arg8[%c0_38, %c64] : memref<2x192xf32, #tpu.memory_space<vmem>>, vector<2x64xf32>
      tpu.vector_store %arg8[%c0_38, %c64], %62 {strides = array<i32>} : memref<2x192xf32, #tpu.memory_space<vmem>>, vector<2x64xf32>,
      %64 = vector.extract_strided_slice %57 {offsets = [2, 0, 0], sizes = [1, 2, 64], strides = [1, 1, 1]} : vector<3x2x64xf32> to vector<1x2x64xf32>
      %65 = vector.shape_cast %64 : vector<1x2x64xf32> to vector<2x64xf32>
      %c0_39 = arith.constant 0 : index
      %c128 = arith.constant 128 : index
      %66 = vector.load %arg8[%c0_39, %c128] : memref<2x192xf32, #tpu.memory_space<vmem>>, vector<2x64xf32>
      tpu.vector_store %arg8[%c0_39, %c128], %65 {strides = array<i32>} : memref<2x192xf32, #tpu.memory_space<vmem>>, vector<2x64xf32>,
    } else {
    }
    return
  }
  func.func @transform_0(%arg0: i32, %arg1: i32) -> (i32, i32, i32, i32) {
    %c0_i32 = arith.constant 0 : i32
    %c0_i32_0 = arith.constant 0 : i32
    %c0_i32_1 = arith.constant 0 : i32
    return %c0_i32, %arg0, %arg1, %c0_i32_0 : i32, i32, i32, i32
  }
  func.func @transform_1(%arg0: i32, %arg1: i32) -> (i32, i32, i32) {
    %c0_i32 = arith.constant 0 : i32
    %c0_i32_0 = arith.constant 0 : i32
    %c0_i32_1 = arith.constant 0 : i32
    return %c0_i32, %arg0, %c0_i32_0 : i32, i32, i32
  }
  func.func @transform_2(%arg0: i32, %arg1: i32) -> (i32, i32) {
    %c0_i32 = arith.constant 0 : i32
    %c0_i32_0 = arith.constant 0 : i32
    %c0_i32_1 = arith.constant 0 : i32
    return %c0_i32, %c0_i32_0 : i32, i32
  }
  func.func @transform_3(%arg0: i32, %arg1: i32) -> (i32, i32) {
    %c0_i32 = arith.constant 0 : i32
    %c0_i32_0 = arith.constant 0 : i32
    %c0_i32_1 = arith.constant 0 : i32
    return %c0_i32, %c0_i32_0 : i32, i32
  }
  func.func @transform_4(%arg0: i32, %arg1: i32) -> (i32, i32, i32) {
    %c0_i32 = arith.constant 0 : i32
    %c0_i32_0 = arith.constant 0 : i32
    %c0_i32_1 = arith.constant 0 : i32
    %c0_i32_2 = arith.constant 0 : i32
    return %c0_i32, %c0_i32_0, %c0_i32_1 : i32, i32, i32
  }
  func.func @transform_5(%arg0: i32, %arg1: i32) -> (i32, i32, i32) {
    %c0_i32 = arith.constant 0 : i32
    %c0_i32_0 = arith.constant 0 : i32
    %c0_i32_1 = arith.constant 0 : i32
    %c0_i32_2 = arith.constant 0 : i32
    return %c0_i32, %c0_i32_0, %c0_i32_1 : i32, i32, i32
  }
  func.func @transform_6(%arg0: i32, %arg1: i32) -> (i32, i32) {
    %c0_i32 = arith.constant 0 : i32
    %c0_i32_0 = arith.constant 0 : i32
    return %arg0, %c0_i32 : i32, i32
  }
}

</mosaic_0001>

<bundles_post_ra>
// kernel: tpu_custom_call.1
= control target key start
LH: loop header
LB: loop body
LE: loop exit
PB: predicated region body
PF: predicated region fallthrough
CT: control target
= control target key end

     0   :  { %11 = vsyncpa [#allocation5], 0  ;;  %s1289_s21 = smov 0   ;;  %s1291_s22 = smov 0   ;;  %s1504_s0 = inlined_call_operand.vmem [shape: bf16[3,2,16,64], index: 0, kind: input, shape index: {}]   ;;  %s1505_s1 = inlined_call_operand.vmem [shape: bf16[3,2,64], index: 1, kind: input, shape index: {}]   ;;  %s1506_s2 = inlined_call_operand.vmem [shape: f32[3,128], index: 2, kind: input, shape index: {}]   ;;  %s1507_s3 = inlined_call_operand.vmem [shape: f32[3,128], index: 3, kind: input, shape index: {}]   ;;  %s1508_s4 = inlined_call_operand.vmem [shape: bf16[3,128,64], index: 4, kind: input, shape index: {}]   ;;  %s1509_s5 = inlined_call_operand.vmem [shape: f32[3,1,64], index: 5, kind: input, shape index: {}]   ;;  %s1510_s6 = inlined_call_operand.hbm [shape: f32[2,192], index: 6, kind: output, shape index: {}]  }
   0x1   :  { %s1293_s23 = smov 0   ;;  %s1295_s24 = smov 0  }
   0x2   :  { %s1297_s25 = smov 0  }
   0x3 LB: > { %s954_s26 = sadd.s32 4294967295, %s1248_s25   ;;  %s26_s27 = sadd.s32 1, %s1244_s24  ;;  %s1248_s25 = sphi %s1297_s25, %s17_s25   ;;  %s1244_s24 = sphi %s1295_s24, %s1514_s24   ;;  %s1240_s23 = sphi %s1293_s23, %s1513_s23   ;;  %s1236_s22 = sphi %s1291_s22, %s1512_s22   ;;  %s1232_s21 = sphi %s1289_s21, %s1511_s21  }
   0x4   : > { %p27_p0 = scmp.ge.s32.totalorder %s26_s27, 2  ;;  %p45_p1 = scmp.ne.s32.totalorder %s1236_s22, %s1232_s21 }
   0x5   : > { %p46_p2 = scmp.eq.s32.totalorder %s1248_s25, 0  ;;  %s38_s29 = sadd.s32 1, %s1236_s22 }
   0x6   : > { %s1516_s27 = smov (%p27_p0, %s26_s27), 0  ;;  %p957_p5 = scmp.ge.s32.totalorder %s1248_s25, 2 }
   0x7   : > { %p47_p3 = por %p46_p2, %p45_p1  ;;  %s34_s28 = ssub.s32 %s1244_s24, %s1516_s27 }
   0x8   : > { %p36_p4 = scmp.eq.s32.totalorder %s34_s28, 0  ;;  %225 = sbr.rel (%p957_p5) target bundleno = 24 (0x18), region = 36 }
   0xa   : > { %s1325_s30 = scalar_select %p36_p4, %s1236_s22, %s38_s29  }
   0xd   : > { %228 = sbr.rel (!%p47_p3) target bundleno = 24 (0x18), region = 40  ;;  %s230_s7 = sand.u32 (%p47_p3), 1, %s1236_s22  }
   0xe   : > { %s958_s8 = sshll.u32 (%p47_p3), %s1244_s24, 2  ;;  %s1103_s9 = smul.u32 (%p47_p3), 24, %s230_s7 }
   0xf   : > { %s237_s12 = scalar_lea.vmem (%p47_p3), %s1504_s0, %s958_s8 }
  0x10   : > { %v254_v0 = vld [vmem:[%s237_s12] sm:$0xf] (%p47_p3)  ;;  %v256_v1 = vld [vmem:[%s237_s12 + $0x8] sm:$0xf] (%p47_p3)  ;;  %v258_v2 = vld [vmem:[%s237_s12 + $0x10] sm:$0xf] (%p47_p3) }
  0x11   : > { %s232_s13 = scalar_lea.vmem (%p47_p3), [#allocation3], %s1103_s9  ;;  %v260_v3 = vld [vmem:[%s237_s12 + $0x18] sm:$0xf] (%p47_p3)  ;;  %v262_v4 = vld [vmem:[%s237_s12 + $0x20] sm:$0xf] (%p47_p3) }
  0x12   : > { %255 = vst [vmem:[%s232_s13] sm:$0xf] %v254_v0  ;;  %v264_v5 = vld [vmem:[%s237_s12 + $0x28] sm:$0xf] }
  0x13   : > { %257 = vst [vmem:[%s232_s13 + $0x4] sm:$0xf] %v256_v1 }
  0x14   : > { %259 = vst [vmem:[%s232_s13 + $0x8] sm:$0xf] %v258_v2 }
  0x15   : > { %261 = vst [vmem:[%s232_s13 + $0xc] sm:$0xf] %v260_v3 }
  0x16   : > { %263 = vst [vmem:[%s232_s13 + $0x10] sm:$0xf] %v262_v4 }
  0x17   : > { %265 = vst [vmem:[%s232_s13 + $0x14] sm:$0xf] %v264_v5 }
  0x18 PF: > { %p959_p6 = scmp.ge.s32.totalorder %s1248_s25, 1  ;;  %p300_p7 = scmp.lt.s32.totalorder %s1248_s25, 3 }
  0x1a   : > { %p301_p8 = pnand %p959_p6, %p300_p7 }
  0x1b   : > { %s307_s14 = sand.u32 (!%p301_p8), 1, %s1232_s21   ;;  %p960_p9 = scmp.ne.s32.totalorder (!%p301_p8), %s1240_s23, 0 }
  0x1c   : > { %304 = sbr.rel (%p301_p8) target bundleno = 716 (0x2cc), region = 81 }
  0x1d   : > { %s1104_s15 = smul.u32 (!%p301_p8), 24, %s307_s14 }
  0x1f   : > { %s309_s16 = scalar_lea.vmem (!%p301_p8), [#allocation3], %s1104_s15 }
  0x21   : > { %341 = sbr.rel (%p960_p9) target bundleno = 42 (0x2a), region = 89 }
  0x26   : > { %vm342_vm0 = vcmask 517120   ;;  %v1250_v6 = vmov 0.0  }
  0x27   : > { %343 = vst.msk [vmem:[#allocation2] sm:$0x3] %vm342_vm0, %v1250_v6 }
  0x28   : > { %344 = vst.msk [vmem:[#allocation2 + $0x2] sm:$0x3] %vm342_vm0, %v1250_v6 }
  0x29   : > { %345 = vst.msk [vmem:[#allocation2 + $0x4] sm:$0x3] %vm342_vm0, %v1250_v6 }
  0x2a PF: > { %v1090_v7 = vld [vmem:[%s309_s16] sm:$0xff]   ;;  %vm361_vm1 = vcmask 523264   ;;  %v1101_v10 = vld [vmem:[%s309_s16 + $0x8] sm:$0xff]   ;;  %v1102_v13 = vld [vmem:[%s309_s16 + $0x10] sm:$0xff]   ;;  %vm410_vm2 = vcmask 1041409   ;;  %vm420_vm3 = vcmask 517120  }
  0x2b   : > { %v1091_v8 = vunpack.c.l.bf16 %v1090_v7  ;;  %v1092_v9 = vunpack.c.h.bf16 %v1090_v7  ;;  %v1095_v11 = vunpack.c.l.bf16 %v1101_v10  ;;  %v1096_v12 = vunpack.c.h.bf16 %v1101_v10  ;;  %p961_p10 = scmp.ne.s32.totalorder %s1240_s23, 1 }
  0x2c   : > { %v1099_v16 = vunpack.c.l.bf16 %v1102_v13  ;;  %v1100_v17 = vunpack.c.h.bf16 %v1102_v13  ;;  %s1251_s17 = smov (!%p961_p10), 64  }
  0x2d   : > { %v362_v14 = vsel %vm361_vm1, %v1091_v8, 0.0  ;;  %v369_v15 = vsel %vm361_vm1, %v1092_v9, 0.0  ;;  %v376_v20 = vsel %vm361_vm1, %v1095_v11, 0.0  ;;  %v383_v21 = vsel %vm361_vm1, %v1096_v12, 0.0 }
  0x2e   : > { %v363_v18 = vrot.slane %v362_v14, 4  ;;  %v370_v19 = vrot.slane %v369_v15, 4  ;;  %v377_v22 = vrot.slane %v376_v20, 4  ;;  %v384_v23 = vrot.slane %v383_v21, 4  ;;  %v346_v50 = vld [vmem:[#allocation2] sm:$0x3] }
  0x2f   : > { %v390_v24 = vsel %vm361_vm1, %v1099_v16, 0.0  ;;  %v397_v25 = vsel %vm361_vm1, %v1100_v17, 0.0  ;;  %v347_v55 = vld [vmem:[#allocation2 + $0x2] sm:$0x3] }
  0x30   : > { %v364_v26 = vadd.f32 %v363_v18, %v362_v14  ;;  %v371_v27 = vadd.f32 %v370_v19, %v369_v15  ;;  %v391_v28 = vrot.slane %v390_v24, 4  ;;  %v398_v29 = vrot.slane %v397_v25, 4  ;;  %v348_v59 = vld [vmem:[#allocation2 + $0x4] sm:$0x3] }
  0x31   : > { %v378_v30 = vadd.f32 %v377_v22, %v376_v20  ;;  %v385_v31 = vadd.f32 %v384_v23, %v383_v21 }
  0x32   : > { %v365_v32 = vrot.slane %v364_v26, 2  ;;  %v372_v33 = vrot.slane %v371_v27, 2  ;;  %v392_v34 = vadd.f32 %v391_v28, %v390_v24  ;;  %v399_v35 = vadd.f32 %v398_v29, %v397_v25 }
  0x33   : > { %v379_v36 = vrot.slane %v378_v30, 2  ;;  %v386_v37 = vrot.slane %v385_v31, 2 }
  0x34   : > { %v366_v38 = vadd.f32 %v365_v32, %v364_v26  ;;  %v373_v39 = vadd.f32 %v372_v33, %v371_v27  ;;  %v393_v40 = vrot.slane %v392_v34, 2  ;;  %v400_v41 = vrot.slane %v399_v35, 2 }
  0x35   : > { %v380_v42 = vadd.f32 %v379_v36, %v378_v30  ;;  %v387_v43 = vadd.f32 %v386_v37, %v385_v31 }
  0x36   : > { %v367_v44 = vrot.slane %v366_v38, 1  ;;  %v374_v45 = vrot.slane %v373_v39, 1  ;;  %v394_v46 = vadd.f32 %v393_v40, %v392_v34  ;;  %v401_v47 = vadd.f32 %v400_v41, %v399_v35 }
  0x37   : > { %v381_v48 = vrot.slane %v380_v42, 1  ;;  %v388_v49 = vrot.slane %v387_v43, 1 }
  0x38   : > { %v368_v51 = vadd.f32 %v367_v44, %v366_v38  ;;  %v375_v52 = vadd.f32 %v374_v45, %v373_v39  ;;  %v395_v53 = vrot.slane %v394_v46, 1  ;;  %v402_v54 = vrot.slane %v401_v47, 1 }
  0x39   : > { %v382_v56 = vadd.f32 %v381_v48, %v380_v42  ;;  %v389_v57 = vadd.f32 %v388_v49, %v387_v43 }
  0x3a   : > { %v411_v58 = vsel %vm410_vm2, %v375_v52, %v368_v51  ;;  %v396_v60 = vadd.f32 %v395_v53, %v394_v46  ;;  %v403_v61 = vadd.f32 %v402_v54, %v401_v47 }
  0x3b   : > { %v417_v62 = vadd.f32 %v411_v58, %v346_v50  ;;  %v412_v63 = vsel %vm410_vm2, %v389_v57, %v382_v56  ;;  %427 = sbr.rel (%p961_p10) target bundleno = 710 (0x2c6), region = 93 }
  0x3c   : > { %v418_v0 = vadd.f32 %v412_v63, %v347_v55  ;;  %v413_v1 = vsel %vm410_vm2, %v403_v61, %v396_v60 }
  0x3d   : > { %421 = vst.msk [vmem:[#allocation2] sm:$0x3] %vm420_vm3, %v417_v62  ;;  %v419_v2 = vadd.f32 %v413_v1, %v348_v59 }
  0x3e   : > { %422 = vst.msk [vmem:[#allocation2 + $0x2] sm:$0x3] %vm420_vm3, %v418_v0 }
  0x3f   : > { %423 = vst.msk [vmem:[#allocation2 + $0x4] sm:$0x3] %vm420_vm3, %v419_v2 }
  0x40   : > { %v429_v9 = vld [vmem:[%s1505_s1 + $0x1] sm:$0x1]  ;;  %vm455_vm4 = vcmask 1041408   ;;  %v430_v14 = vld [vmem:[%s1505_s1 + $0x2] sm:$0x1]  ;;  %v1252_v24 = vmov 128.0  }
  0x41   : > { %v432_v10 = vunpack.c.l.bf16 %v429_v9  ;;  %v433_v15 = vunpack.c.l.bf16 %v430_v14  ;;  %v428_v16 = vld [vmem:[%s1505_s1] sm:$0x1]  ;;  %1158 = vrcp.f32 %v1252_v24  ;;  %v1080_v29 = vld [vmem:[%s1508_s4 + $0x78] sm:$0xff]  ;;  %v1079_v47 = vld [vmem:[%s1508_s4 + $0x70] sm:$0xff] }
  0x42   : > { %v431_v19 = vunpack.c.l.bf16 %v428_v16  ;;  %727 = vmatpush.bf16.msra.mxu1 %v1080_v29  ;;  %v1078_v48 = vld [vmem:[%s1508_s4 + $0x68] sm:$0xff]  ;;  %v1088_v49 = vld [vmem:[%s1508_s4 + $0xb8] sm:$0xff]  ;;  %v1077_v50 = vld [vmem:[%s1508_s4 + $0x60] sm:$0xff] }
  0x43   : > { %788 = vmatpush.bf16.msra.mxu2 %v1088_v49  ;;  %v1087_v51 = vld [vmem:[%s1508_s4 + $0xb0] sm:$0xff]  ;;  %v1072_v52 = vld [vmem:[%s1508_s4 + $0x38] sm:$0xff]  ;;  %v1086_v54 = vld [vmem:[%s1508_s4 + $0xa8] sm:$0xff] }
  0x44   : > { %v434_v5 = vld [vmem:[#allocation2] sm:$0x3]  ;;  %v1076_v53 = vld [vmem:[%s1508_s4 + $0x58] sm:$0xff]  ;;  %666 = vmatpush.bf16.msra.mxu0 %v1072_v52  ;;  %v1071_v55 = vld [vmem:[%s1508_s4 + $0x30] sm:$0xff] }
  0x45   : > { %v435_v3 = vld [vmem:[#allocation2 + $0x2] sm:$0x3]  ;;  %v437_v6 = vmul.f32 0.0625, %v434_v5  ;;  %v1075_v56 = vld [vmem:[%s1508_s4 + $0x50] sm:$0xff]  ;;  %v1070_v58 = vld [vmem:[%s1508_s4 + $0x28] sm:$0xff] }
  0x46   : > { %v438_v4 = vmul.f32 0.0625, %v435_v3  ;;  %v436_v7 = vld [vmem:[#allocation2 + $0x4] sm:$0x3]  ;;  %728 = vmatpush.bf16.msra.mxu1 %v1079_v47  ;;  %v1074_v59 = vld [vmem:[%s1508_s4 + $0x48] sm:$0xff]  ;;  %v1084_v60 = vld [vmem:[%s1508_s4 + $0x98] sm:$0xff] }
  0x47   : > { %443 = vrot.lane.b32.xlu1 %v437_v6, %s1251_s17  ;;  %v439_v8 = vmul.f32 0.0625, %v436_v7  ;;  %v1159_v25 = vpop.eup %1158  ;;  %789 = vmatpush.bf16.msra.mxu2 %v1087_v51  ;;  %v1085_v57 = vld [vmem:[%s1508_s4 + $0xa0] sm:$0xff]  ;;  %v1083_v63 = vld [vmem:[%s1508_s4 + $0x90] sm:$0xff]  ;;  %v1068_v0 = vld [vmem:[%s1508_s4 + $0x18] sm:$0xff] }
  0x48   : > { %445 = vrot.lane.b32.xlu0 %v438_v4, %s1251_s17  ;;  %v466_v26 = vmul.f32 128.0, %v1159_v25  ;;  %vm470_vm5 = vweird.f32 %v1159_v25  ;;  %667 = vmatpush.bf16.msra.mxu0 %v1071_v55  ;;  %v1069_v61 = vld [vmem:[%s1508_s4 + $0x20] sm:$0xff]  ;;  %v1082_v1 = vld [vmem:[%s1508_s4 + $0x88] sm:$0xff]  ;;  %v1067_v4 = vld [vmem:[%s1508_s4 + $0x10] sm:$0xff] }
  0x49   : > { %v1073_v62 = vld [vmem:[%s1508_s4 + $0x40] sm:$0xff]  ;;  %v1066_v7 = vld [vmem:[%s1508_s4 + $0x8] sm:$0xff] }
  0x4a   : > { %v467_v27 = vsub.f32 1.0, %v466_v26  ;;  %729 = vmatpush.bf16.msra.mxu1 %v1078_v48  ;;  %v1081_v5 = vld [vmem:[%s1508_s4 + $0x80] sm:$0xff] }
  0x4b   : > { %790 = vmatpush.bf16.msra.mxu2 %v1086_v54  ;;  %v1065_v9 = vld [vmem:[%s1508_s4] sm:$0xff] }
  0x4c   : > { %v468_v28 = vmul.f32 %v1159_v25, %v467_v27  ;;  %668 = vmatpush.bf16.msra.mxu0 %v1070_v58 }
  0x4e   : > { %v469_v30 = vadd.f32 %v1159_v25, %v468_v28  ;;  %730 = vmatpush.bf16.msra.mxu1 %v1077_v50 }
  0x4f   : > { %791 = vmatpush.bf16.msra.mxu2 %v1085_v57 }
  0x50   : > { %447 = vrot.lane.b32.xlu0 %v439_v8, %s1251_s17  ;;  %v1371_v31 = vsel %vm470_vm5, %v1159_v25, %v469_v30  ;;  %669 = vmatpush.bf16.msra.mxu0 %v1069_v61 }
  0x52   : > { %731 = vmatpush.bf16.msra.mxu1 %v1076_v53 }
  0x53   : > { %792 = vmatpush.bf16.msra.mxu2 %v1084_v60 }
  0x54   : > { %670 = vmatpush.bf16.msra.mxu0 %v1068_v0 }
  0x56   : > { %732 = vmatpush.bf16.msra.mxu1 %v1075_v56 }
  0x57   : > { %793 = vmatpush.bf16.msra.mxu2 %v1083_v63 }
  0x58   : > { %671 = vmatpush.bf16.msra.mxu0 %v1067_v4  ;;  %v1157_v4 = vld [vmem:[%s1509_s5] ss:$0 sm:$0xff] }
  0x5a   : > { %733 = vmatpush.bf16.msra.mxu1 %v1074_v59 }
  0x5b   : > { %794 = vmatpush.bf16.msra.mxu2 %v1082_v1 }
  0x5c   : > { %672 = vmatpush.bf16.msra.mxu0 %v1066_v7 }
  0x5e   : > { %734 = vmatpush.bf16.msra.mxu1 %v1073_v62 }
  0x5f   : > { %795 = vmatpush.bf16.msra.mxu2 %v1081_v5 }
  0x60   : > { %673 = vmatpush.bf16.msra.mxu0 %v1065_v9 }
  0xb9   : > { %v444_v21 = vpop.permute.xlu1 %443 }
  0xba   : > { %v446_v11 = vpop.permute.xlu0 %445  ;;  %v452_v22 = vsel %vm361_vm1, %v431_v19, %v444_v21 }
  0xbb   : > { %v453_v12 = vsel %vm361_vm1, %v432_v10, %v446_v11  ;;  %v456_v23 = vsel %vm455_vm4, %v452_v22, 0.0 }
  0xbc   : > { %v459_v13 = vsel %vm455_vm4, %v453_v12, 0.0 }
  0xbd   : > { %460 = vadd.xlane.f32.xlu1 %v459_v13 }
  0xc2   : > { %v448_v17 = vpop.permute.xlu0 %447 }
  0xc3   : > { %v454_v18 = vsel %vm361_vm1, %v433_v15, %v448_v17  ;;  %v529_v15 = vld [vmem:[%s1506_s2] sm:$0x7] }
  0xc4   : > { %v462_v20 = vsel %vm455_vm4, %v454_v18, 0.0  ;;  %v533_v55 = vperm.slane %v529_v15, 0 }
  0xc5   : > { %463 = vadd.xlane.f32.xlu2 %v462_v20  ;;  %v531_v20 = vrot.slane %v529_v15, 1 }
  0xc7   : > { %v534_v27 = vperm.slane %v531_v20, 0 }
  0xcd   : > { %457 = vadd.xlane.f32.xlu2 %v456_v23 }
 0x130   : > { %v461_v32 = vpop.xlane.xlu1 %460 }
 0x131   : > { %v473_v33 = vmul.f32 %v1371_v31, %v461_v32 }
 0x133   : > { %v1374_v34 = vsub.f32 %v453_v12, %v473_v33 }
 0x135   : > { %v479_v35 = vmul.f32 %v1374_v34, %v1374_v34 }
 0x137   : > { %v484_v36 = vsel %vm455_vm4, %v479_v35, 0.0 }
 0x138   : > { %v464_v37 = vpop.xlane.xlu2 %463  ;;  %485 = vadd.xlane.f32.xlu0 %v484_v36 }
 0x139   : > { %v474_v38 = vmul.f32 %v1371_v31, %v464_v37 }
 0x13b   : > { %v1380_v39 = vsub.f32 %v454_v18, %v474_v38  ;;  %v542_v18 = vld [vmem:[%s1507_s3] sm:$0x7] }
 0x13c   : > { %v544_v24 = vrot.slane %v542_v18, 1  ;;  %v546_v58 = vperm.slane %v542_v18, 0 }
 0x13d   : > { %v480_v40 = vmul.f32 %v1380_v39, %v1380_v39 }
 0x13e   : > { %v547_v32 = vperm.slane %v544_v24, 0 }
 0x13f   : > { %v487_v41 = vsel %vm455_vm4, %v480_v40, 0.0  ;;  %v545_v40 = vrot.slane %v542_v18, 2 }
 0x140   : > { %488 = vadd.xlane.f32.xlu2 %v487_v41  ;;  %v458_v42 = vpop.xlane.xlu2 %457 }
 0x141   : > { %v472_v43 = vmul.f32 %v1371_v31, %v458_v42  ;;  %v548_v48 = vperm.slane %v545_v40, 0 }
 0x143   : > { %v1386_v44 = vsub.f32 %v452_v22, %v472_v43 }
 0x145   : > { %v478_v45 = vmul.f32 %v1386_v44, %v1386_v44 }
 0x147   : > { %v481_v46 = vsel %vm455_vm4, %v478_v45, 0.0 }
 0x148   : > { %482 = vadd.xlane.f32.xlu2 %v481_v46 }
 0x1ab   : > { %v486_v2 = vpop.xlane.xlu0 %485 }
 0x1ac   : > { %v491_v3 = vmul.f32 %v486_v2, %v1371_v31 }
 0x1ae   : > { %v494_v6 = vadd.f32 1e-05, %v491_v3  ;;  %v1156_v3 = vld [vmem:[%s1509_s5 + $0x2] ss:$0 sm:$0xff] }
 0x1b0   : > { %1160 = vrsqrt.f32 %v494_v6  ;;  %vm512_vm7 = vweird.f32 %v494_v6 }
 0x1b3   : > { %v489_v8 = vpop.xlane.xlu2 %488 }
 0x1b4   : > { %v492_v10 = vmul.f32 %v489_v8, %v1371_v31 }
 0x1b6   : > { %v1161_v11 = vpop.eup %1160  ;;  %v495_v12 = vadd.f32 1e-05, %v492_v10 }
 0x1b7   : > { %v507_v13 = vmul.f32 %v1161_v11, %v494_v6  ;;  %vm513_vm6 = vweird.f32 %v1161_v11 }
 0x1b8   : > { %1162 = vrsqrt.f32 %v495_v12  ;;  %vm514_vm8 = vmor %vm512_vm7, %vm513_vm6  ;;  %vm522_vm10 = vweird.f32 %v495_v12 }
 0x1b9   : > { %v508_v14 = vmul.f32 %v1161_v11, %v507_v13 }
 0x1bb   : > { %v509_v16 = vmul.f32 0.5, %v508_v14  ;;  %v483_v17 = vpop.xlane.xlu2 %482 }
 0x1bc   : > { %v490_v19 = vmul.f32 %v483_v17, %v1371_v31  ;;  %v532_v31 = vrot.slane %v529_v15, 2 }
 0x1bd   : > { %v510_v21 = vsub.f32 1.5, %v509_v16 }
 0x1be   : > { %v1163_v22 = vpop.eup %1162  ;;  %v493_v23 = vadd.f32 1e-05, %v490_v19  ;;  %v535_v45 = vperm.slane %v532_v31, 0 }
 0x1bf   : > { %v511_v25 = vmul.f32 %v1161_v11, %v510_v21  ;;  %v517_v26 = vmul.f32 %v1163_v22, %v495_v12  ;;  %vm523_vm9 = vweird.f32 %v1163_v22 }
 0x1c0   : > { %1164 = vrsqrt.f32 %v493_v23  ;;  %vm524_vm11 = vmor %vm522_vm10, %vm523_vm9  ;;  %vm502_vm13 = vweird.f32 %v493_v23 }
 0x1c1   : > { %v518_v28 = vmul.f32 %v1163_v22, %v517_v26  ;;  %v515_v29 = vsel %vm514_vm8, %v1161_v11, %v511_v25 }
 0x1c2   : > { %v527_v30 = vmul.f32 %v515_v29, %v1374_v34 }
 0x1c3   : > { %v519_v33 = vmul.f32 0.5, %v518_v28 }
 0x1c4   : > { %v540_v35 = vmul.f32 %v534_v27, %v527_v30 }
 0x1c5   : > { %v520_v36 = vsub.f32 1.5, %v519_v33 }
 0x1c6   : > { %v1165_v37 = vpop.eup %1164  ;;  %v553_v38 = vadd.f32 %v547_v32, %v540_v35 }
 0x1c7   : > { %v521_v41 = vmul.f32 %v1163_v22, %v520_v36  ;;  %v497_v42 = vmul.f32 %v1165_v37, %v493_v23  ;;  %vm503_vm12 = vweird.f32 %v1165_v37 }
 0x1c8   : > { %v556_v43 = vpack.c.bf16 %v553_v38, %v553_v38  ;;  %vm504_vm14 = vmor %vm502_vm13, %vm503_vm12  ;;  %vm869_vm12 = vcmask 1041920  }
 0x1c9   : > { %v498_v46 = vmul.f32 %v1165_v37, %v497_v42  ;;  %v525_v47 = vsel %vm524_vm11, %v1163_v22, %v521_v41 }
 0x1ca   : > { %735 = vmatmul.bf16.vlgmr.msra.gmra.mxu1 %v556_v43  ;;  %v528_v34 = vmul.f32 %v525_v47, %v1380_v39  ;;  %v1155_v39 = vld [vmem:[%s1509_s5 + $0x1] ss:$0 sm:$0xff] }
 0x1cb   : > { %v499_v49 = vmul.f32 0.5, %v498_v46 }
 0x1cc   : > { %v541_v50 = vmul.f32 %v535_v45, %v528_v34 }
 0x1cd   : > { %v500_v51 = vsub.f32 1.5, %v499_v49 }
 0x1ce   : > { %v554_v52 = vadd.f32 %v548_v48, %v541_v50 }
 0x1cf   : > { %v501_v53 = vmul.f32 %v1165_v37, %v500_v51 }
 0x1d0   : > { %v557_v54 = vpack.c.bf16 %v554_v52, %v554_v52 }
 0x1d1   : > { %v505_v56 = vsel %vm504_vm14, %v1165_v37, %v501_v53 }
 0x1d2   : > { %796 = vmatmul.bf16.vlgmr.msra.gmra.mxu2 %v557_v54  ;;  %v526_v57 = vmul.f32 %v505_v56, %v1386_v44 }
 0x1d4   : > { %v539_v59 = vmul.f32 %v533_v55, %v526_v57 }
 0x1d6   : > { %v552_v60 = vadd.f32 %v546_v58, %v539_v59 }
 0x1d8   : > { %v555_v61 = vpack.c.bf16 %v552_v60, %v552_v60 }
 0x1da   : > { %674 = vmatmul.bf16.vlgmr.msra.gmra.mxu0 %v555_v61 }
 0x247   : > { %v736_v62 = vpop.f32.mrf.mxu1 }
 0x248   : > { %v737_v63 = vadd.f32 %v1155_v39, %v736_v62 }
 0x24a   : > { %v1059_v0 = vmul.f32 -1.702, %v737_v63 }
 0x24c   : > { %v809_v1 = vmul.f32 1.442695, %v1059_v0 }
 0x24e   : > { %1166 = vpow2.f32 %v809_v1 }
 0x24f   : > { %v738_v2 = vpop.f32.mrf.mxu1 }
 0x254   : > { %v1167_v44 = vpop.eup %1166 }
 0x255   : > { %v814_v5 = vadd.f32 1.0, %v1167_v44  ;;  %v797_v6 = vpop.f32.mrf.mxu2 }
 0x256   : > { %v798_v7 = vadd.f32 %v1156_v3, %v797_v6 }
 0x257   : > { %1168 = vrcp.f32 %v814_v5  ;;  %v675_v8 = vpop.f32.mrf.mxu0  ;;  %v842_v19 = vand.u32 2147483648, %v814_v5  ;;  %v840_v22 = vand.u32 2147483647, %v814_v5  ;;  %vm836_vm0 = vweird.f32 %v814_v5 }
 0x258   : > { %v1060_v9 = vmul.f32 -1.702, %v798_v7  ;;  %v676_v10 = vadd.f32 %v1157_v4, %v675_v8 }
 0x259   : > { %v843_v26 = vor.u32 1.1754944e-38, %v842_v19  ;;  %vm841_vm2 = vcmp.eq.f32.partialorder %v840_v22, 8.507059e+37 }
 0x25a   : > { %v811_v11 = vmul.f32 1.442695, %v1060_v9  ;;  %v1058_v12 = vmul.f32 -1.702, %v676_v10 }
 0x25c   : > { %1170 = vpow2.f32 %v811_v11  ;;  %v807_v13 = vmul.f32 1.442695, %v1058_v12 }
 0x25d   : > { %v1169_v14 = vpop.eup %1168  ;;  %v799_v15 = vpop.f32.mrf.mxu2 }
 0x25e   : > { %v832_v16 = vmul.f32 %v1169_v14, %v814_v5  ;;  %1172 = vpow2.f32 %v807_v13  ;;  %vm837_vm15 = vweird.f32 %v1169_v14 }
 0x25f   : > { %v677_v17 = vpop.f32.mrf.mxu0  ;;  %vm838_vm1 = vmor %vm836_vm0, %vm837_vm15 }
 0x260   : > { %v833_v18 = vsub.f32 1.0, %v832_v16 }
 0x262   : > { %v1171_v20 = vpop.eup %1170  ;;  %v834_v21 = vmul.f32 %v1169_v14, %v833_v18 }
 0x263   : > { %v815_v23 = vadd.f32 1.0, %v1171_v20 }
 0x264   : > { %v1173_v24 = vpop.eup %1172  ;;  %v835_v25 = vadd.f32 %v1169_v14, %v834_v21 }
 0x265   : > { %1174 = vrcp.f32 %v815_v23  ;;  %v813_v28 = vadd.f32 1.0, %v1173_v24  ;;  %v857_v36 = vand.u32 2147483648, %v815_v23  ;;  %v855_v40 = vand.u32 2147483647, %v815_v23 }
 0x266   : > { %v839_v27 = vsel %vm838_vm1, %v1169_v14, %v835_v25  ;;  %vm851_vm5 = vweird.f32 %v815_v23 }
 0x267   : > { %v844_v29 = vsel %vm841_vm2, %v843_v26, %v839_v27  ;;  %1176 = vrcp.f32 %v813_v28  ;;  %v827_v43 = vand.u32 2147483648, %v813_v28  ;;  %v858_v45 = vor.u32 1.1754944e-38, %v857_v36 }
 0x268   : > { %v862_v30 = vmul.f32 %v844_v29, %v737_v63  ;;  %v825_v47 = vand.u32 2147483647, %v813_v28  ;;  %vm856_vm8 = vcmp.eq.f32.partialorder %v855_v40, 8.507059e+37  ;;  %vm821_vm9 = vweird.f32 %v813_v28 }
 0x269   : > { %v828_v51 = vor.u32 1.1754944e-38, %v827_v43 }
 0x26a   : > { %866 = vrot.lane.b32.xlu2 %v862_v30, %s1251_s17  ;;  %vm826_vm11 = vcmp.eq.f32.partialorder %v825_v47, 8.507059e+37 }
 0x26b   : > { %v1175_v32 = vpop.eup %1174 }
 0x26c   : > { %v847_v33 = vmul.f32 %v1175_v32, %v815_v23  ;;  %vm852_vm4 = vweird.f32 %v1175_v32 }
 0x26d   : > { %v1177_v35 = vpop.eup %1176  ;;  %vm853_vm6 = vmor %vm851_vm5, %vm852_vm4 }
 0x26e   : > { %v848_v31 = vsub.f32 1.0, %v847_v33  ;;  %v817_v37 = vmul.f32 %v1177_v35, %v813_v28  ;;  %vm822_vm7 = vweird.f32 %v1177_v35 }
 0x26f   : > { %vm823_vm10 = vmor %vm821_vm9, %vm822_vm7 }
 0x270   : > { %v849_v38 = vmul.f32 %v1175_v32, %v848_v31  ;;  %v818_v41 = vsub.f32 1.0, %v817_v37 }
 0x272   : > { %v850_v42 = vadd.f32 %v1175_v32, %v849_v38  ;;  %v819_v46 = vmul.f32 %v1177_v35, %v818_v41 }
 0x274   : > { %v854_v34 = vsel %vm853_vm6, %v1175_v32, %v850_v42  ;;  %v820_v49 = vadd.f32 %v1177_v35, %v819_v46 }
 0x275   : > { %v859_v48 = vsel %vm856_vm8, %v858_v45, %v854_v34 }
 0x276   : > { %v863_v50 = vmul.f32 %v859_v48, %v798_v7  ;;  %v824_v52 = vsel %vm823_vm10, %v1177_v35, %v820_v49 }
 0x277   : > { %v829_v53 = vsel %vm826_vm11, %v828_v51, %v824_v52 }
 0x278   : > { %871 = vst.msk [vmem:[#allocation4 + $0x2] sm:$0x3] %vm420_vm3, %v863_v50  ;;  %v861_v54 = vmul.f32 %v829_v53, %v676_v10 }
 0x27a   : > { %864 = vst.msk [vmem:[#allocation4] sm:$0x3] %vm420_vm3, %v861_v54 }
 0x2c4   : > { %v867_v55 = vpop.permute.xlu2 %866 }
 0x2c5   : > { %870 = vst.msk [vmem:[#allocation4] sm:$0x3] %vm869_vm12, %v867_v55 }
 0x2c6 PF: > { %p1109_p11 = scmp.eq.s32.totalorder %s954_s26, 1  ;;  %s883_s14 = sshll.u32 %s1510_s6, 4  ;;  %s884_s14 = int_to_ptr.hbm [resolvable:$true] %s883_s14 }
 0x2c7   : > { %s1253_s15 = smov [#allocation4]  }
 0x2c8   : > { %s881_s16 = sshll.u32 %s1253_s15, 4  ;;  %s882_s16 = int_to_ptr.vmem [resolvable:$true] %s881_s16 }
 0x2c9   : > { %1106 = dma.vmem_to_hbm [thread:$0]  (%p1109_p11), %s882_s16, 64, %s884_s14, [#allocation5]  }
 0x2ca   : > { %1227 = dma.done.wait (%p1109_p11), [#allocation5], 64  }
 0x2cb   : > { %1229 = vsyncadd (%p1109_p11), [#allocation5], 4294967232 }
 0x2cc PF: > { %s17_s25 = sadd.s32 1, %s1248_s25   ;;  %s1511_s21 = smov %s1236_s22 }
 0x2cd   : > { %p14_p12 = scmp.ge.s32.totalorder %s17_s25, 4   ;;  %s1512_s22 = smov %s1325_s30 }
 0x2ce   : > { %s1513_s23 = smov %s1244_s24  ;;  %s1514_s24 = smov %s1516_s27 }
 0x2cf   :  { %16 = sbr.rel (!%p14_p12) target bundleno = 3 (0x3), region = 129 }
 0x2d4   :  { %897 = vsyncpa [#allocation5], 1 }
 0x2d5   :  { %899 = vsyncpa [#allocation5 + $0x1], 1 }

</bundles_post_ra>
